<compile_context>
chip_gen: v5e
topology: v5e:2x2
jax: 0.10.0
libtpu: 0.0.40
codegen_flags: <defaults>
</compile_context>

<pallas_src>
import jax
import jax.numpy as jnp
from jax.experimental import pallas as pl
from jax.experimental.pallas import tpu as pltpu

BASE_OUT = 80                 # each frozen base model emits 80 features
H1, H2, OUT = 180, 120, 80    # logical head dims (PyTorch module)
H1P, H2P, OUTP = 256, 128, 128  # lane-padded (multiple-of-128) dims used in-kernel


def _round_up(x, m):
    return (x + m - 1) // m * m


def _make_head_kernel(n_models):
    def kernel(*refs):
        # refs: x_0..x_{n-1}, w1_0..w1_{n-1}, b1, w2, b2, w3, b3, out
        xs = refs[:n_models]
        w1s = refs[n_models:2 * n_models]
        b1_ref, w2_ref, b2_ref, w3_ref, b3_ref, o_ref = refs[2 * n_models:]

        # fc_1 over the (virtually) concatenated base-model outputs:
        #   concat(x_i) @ W1 == sum_i x_i @ W1[i*80:(i+1)*80]
        h1 = jnp.dot(xs[0][...], w1s[0][...], preferred_element_type=jnp.float32)
        for i in range(1, n_models):
            h1 = h1 + jnp.dot(xs[i][...], w1s[i][...],
                              preferred_element_type=jnp.float32)
        h1 = jnp.maximum(h1 + b1_ref[...], 0.0)          # f32 epilogue (v5e-safe)

        h2 = jnp.dot(h1.astype(jnp.bfloat16), w2_ref[...],
                     preferred_element_type=jnp.float32)
        h2 = jnp.maximum(h2 + b2_ref[...], 0.0)

        o = jnp.dot(h2.astype(jnp.bfloat16), w3_ref[...],
                    preferred_element_type=jnp.float32) + b3_ref[...]
        o_ref[...] = o.astype(o_ref.dtype)

    return kernel


def prepare_params(w1, b1, w2, b2, w3, b3, n_models):
    """Split fc_1 per base model, zero-pad feature dims to lane multiples,
    cast weights to bf16 (accumulation stays f32 inside the kernel)."""
    assert w1.shape == (BASE_OUT * n_models, H1)
    w1_blocks = []
    for i in range(n_models):
        blk = w1[i * BASE_OUT:(i + 1) * BASE_OUT, :]                  # [80, 180]
        blk = jnp.pad(blk, ((0, 0), (0, H1P - H1)))                   # [80, 256]
        w1_blocks.append(blk.astype(jnp.bfloat16))
    b1p = jnp.pad(b1.reshape(1, H1), ((0, 0), (0, H1P - H1))).astype(jnp.float32)
    w2p = jnp.pad(w2, ((0, H1P - H1), (0, H2P - H2))).astype(jnp.bfloat16)   # [256,128]
    b2p = jnp.pad(b2.reshape(1, H2), ((0, 0), (0, H2P - H2))).astype(jnp.float32)
    w3p = jnp.pad(w3, ((0, H2P - H2), (0, OUTP - OUT))).astype(jnp.bfloat16)  # [128,128]
    b3p = jnp.pad(b3.reshape(1, OUT), ((0, 0), (0, OUTP - OUT))).astype(jnp.float32)
    return w1_blocks, b1p, w2p, b2p, w3p, b3p


def ensemble_head(x_list, padded_params, *, block_m=512):
    """x_list: list of N frozen base-model outputs, each [B, 80] (any float dtype).
    Returns the fc_3 output [B, 80] in f32."""
    w1_blocks, b1p, w2p, b2p, w3p, b3p = padded_params
    n_models = len(x_list)
    assert len(w1_blocks) == n_models
    B = x_list[0].shape[0]

    # Batch tile: multiple of 16 (bf16 sublane packing), capped at block_m so the
    # double-buffered x/out tiles stay far under v7x's 64 MiB VMEM.
    tm = min(block_m, _round_up(max(B, 1), 16))
    b_pad = _round_up(B, tm)

    xs = [x.astype(jnp.bfloat16) for x in x_list]
    if b_pad != B:
        xs = [jnp.pad(x, ((0, b_pad - B), (0, 0))) for x in xs]

    grid = (b_pad // tm,)
    const2 = lambda i: (0, 0)

    in_specs = (
        [pl.BlockSpec((tm, BASE_OUT), lambda i: (i, 0)) for _ in range(n_models)]
        + [pl.BlockSpec((BASE_OUT, H1P), const2) for _ in range(n_models)]
        + [
            pl.BlockSpec((1, H1P), const2),
            pl.BlockSpec((H1P, H2P), const2),
            pl.BlockSpec((1, H2P), const2),
            pl.BlockSpec((H2P, OUTP), const2),
            pl.BlockSpec((1, OUTP), const2),
        ]
    )
    out_spec = pl.BlockSpec((tm, OUTP), lambda i: (i, 0))

    cost = pl.CostEstimate(
        flops=2 * B * (BASE_OUT * n_models * H1 + H1 * H2 + H2 * OUT),
        transcendentals=0,
        bytes_accessed=(B * BASE_OUT * n_models * 2          # bf16 base outputs
                        + B * OUT * 4                        # f32 head output
                        + (BASE_OUT * n_models * H1P + H1P * H2P + H2P * OUTP) * 2),
    )

    out_padded = pl.pallas_call(
        _make_head_kernel(n_models),
        out_shape=jax.ShapeDtypeStruct((b_pad, OUTP), jnp.float32),
        grid=grid,
        in_specs=in_specs,
        out_specs=out_spec,
        compiler_params=pltpu.CompilerParams(
            dimension_semantics=("parallel",),   # shards batch tiles across TCs (v7x)
            vmem_limit_bytes=32 << 20,
        ),
        cost_estimate=cost,
    )(*xs, *w1_blocks, b1p, w2p, b2p, w3p, b3p)

    return out_padded[:B, :OUT]


def _init_linear(key, fan_in, fan_out):
    # Matches torch.nn.Linear default init: U(-1/sqrt(fan_in), 1/sqrt(fan_in))
    bound = 1.0 / jnp.sqrt(jnp.float32(fan_in))
    kw, kb = jax.random.split(key)
    w = jax.random.uniform(kw, (fan_in, fan_out), jnp.float32, -bound, bound)
    b = jax.random.uniform(kb, (fan_out,), jnp.float32, -bound, bound)
    return w, b


if __name__ == "__main__":
    key = jax.random.PRNGKey(0)
    n_models = 2
    batch = 4

    keys = jax.random.split(key, n_models + 3)

    # Frozen base-model 80-dim outputs (stand-ins for model_shakespeare() outputs).
    x_list = [jax.random.normal(keys[i], (batch, BASE_OUT), jnp.float32)
              for i in range(n_models)]

    w1, b1 = _init_linear(keys[n_models + 0], BASE_OUT * n_models, H1)
    w2, b2 = _init_linear(keys[n_models + 1], H1, H2)
    w3, b3 = _init_linear(keys[n_models + 2], H2, OUT)

    params = prepare_params(w1, b1, w2, b2, w3, b3, n_models)

    out = ensemble_head(x_list, params)
    out = jax.block_until_ready(out)
    assert out.shape == (batch, OUT)

    # Pure-JAX reference using the same bf16-quantized weights/activations
    # (bf16 products are exact in f32; only accumulation order differs).
    q = lambda a: a.astype(jnp.bfloat16).astype(jnp.float32)
    x_cat = jnp.concatenate([q(x) for x in x_list], axis=1)
    h = jnp.maximum(x_cat @ q(w1) + b1, 0.0)
    h = jnp.maximum(q(h) @ q(w2) + b2, 0.0)
    ref = q(h) @ q(w3) + b3
    assert jnp.allclose(out, ref, atol=1e-2, rtol=1e-2), \
        float(jnp.max(jnp.abs(out - ref)))

    print("KERNEL_OK")
</pallas_src>

<mosaic_0001>
module attributes {stable_mosaic.version = 11 : i64} {
  func.func @kernel(%arg0: i32, %arg1: memref<16x80xbf16, #tpu.memory_space<vmem>>, %arg2: memref<16x80xbf16, #tpu.memory_space<vmem>>, %arg3: memref<80x256xbf16, #tpu.memory_space<vmem>>, %arg4: memref<80x256xbf16, #tpu.memory_space<vmem>>, %arg5: memref<1x256xf32, #tpu.memory_space<vmem>>, %arg6: memref<256x128xbf16, #tpu.memory_space<vmem>>, %arg7: memref<1x128xf32, #tpu.memory_space<vmem>>, %arg8: memref<128x128xbf16, #tpu.memory_space<vmem>>, %arg9: memref<1x128xf32, #tpu.memory_space<vmem>>, %arg10: memref<16x128xf32, #tpu.memory_space<vmem>>) attributes {dimension_semantics = [#tpu.dimension_semantics<parallel>], iteration_bounds = array<i64: 1>, scalar_prefetch = 0 : i64, scratch_operands = 0 : i64, tpu.core_type = #tpu.core_type<tc>, window_params = [{transform_indices = @transform_0, window_bounds = array<i64: 16, 80>}, {transform_indices = @transform_1, window_bounds = array<i64: 16, 80>}, {pipeline_mode = #tpu.pipeline_mode<synchronous>, transform_indices = @transform_2, window_bounds = array<i64: 80, 256>}, {pipeline_mode = #tpu.pipeline_mode<synchronous>, transform_indices = @transform_3, window_bounds = array<i64: 80, 256>}, {pipeline_mode = #tpu.pipeline_mode<synchronous>, transform_indices = @transform_4, window_bounds = array<i64: 1, 256>}, {pipeline_mode = #tpu.pipeline_mode<synchronous>, transform_indices = @transform_5, window_bounds = array<i64: 256, 128>}, {pipeline_mode = #tpu.pipeline_mode<synchronous>, transform_indices = @transform_6, window_bounds = array<i64: 1, 128>}, {pipeline_mode = #tpu.pipeline_mode<synchronous>, transform_indices = @transform_7, window_bounds = array<i64: 128, 128>}, {pipeline_mode = #tpu.pipeline_mode<synchronous>, transform_indices = @transform_8, window_bounds = array<i64: 1, 128>}, {transform_indices = @transform_9, window_bounds = array<i64: 16, 128>}]} {
    %c0 = arith.constant 0 : index
    %c0_0 = arith.constant 0 : index
    %0 = vector.load %arg1[%c0, %c0_0] : memref<16x80xbf16, #tpu.memory_space<vmem>>, vector<16x80xbf16>
    %c0_1 = arith.constant 0 : index
    %c0_2 = arith.constant 0 : index
    %1 = vector.load %arg3[%c0_1, %c0_2] : memref<80x256xbf16, #tpu.memory_space<vmem>>, vector<80x256xbf16>
    %cst = arith.constant dense<0.000000e+00> : vector<16x256xf32>
    %2 = tpu.matmul %0, %1, %cst {dimension_numbers = #tpu.dot_dimension_numbers<[1], [0], [0], [1], [0, 0, 1, 1], [], []>} : vector<16x80xbf16>, vector<80x256xbf16>, vector<16x256xf32> -> vector<16x256xf32>
    %c0_3 = arith.constant 0 : index
    %c0_4 = arith.constant 0 : index
    %3 = vector.load %arg2[%c0_3, %c0_4] : memref<16x80xbf16, #tpu.memory_space<vmem>>, vector<16x80xbf16>
    %c0_5 = arith.constant 0 : index
    %c0_6 = arith.constant 0 : index
    %4 = vector.load %arg4[%c0_5, %c0_6] : memref<80x256xbf16, #tpu.memory_space<vmem>>, vector<80x256xbf16>
    %cst_7 = arith.constant dense<0.000000e+00> : vector<16x256xf32>
    %5 = tpu.matmul %3, %4, %cst_7 {dimension_numbers = #tpu.dot_dimension_numbers<[1], [0], [0], [1], [0, 0, 1, 1], [], []>} : vector<16x80xbf16>, vector<80x256xbf16>, vector<16x256xf32> -> vector<16x256xf32>
    %6 = arith.addf %2, %5 : vector<16x256xf32>
    %c0_8 = arith.constant 0 : index
    %c0_9 = arith.constant 0 : index
    %7 = vector.load %arg5[%c0_8, %c0_9] : memref<1x256xf32, #tpu.memory_space<vmem>>, vector<1x256xf32>
    %8 = vector.broadcast %7 : vector<1x256xf32> to vector<16x256xf32>
    %9 = arith.addf %6, %8 : vector<16x256xf32>
    %cst_10 = arith.constant 0.000000e+00 : f32
    %10 = vector.broadcast %cst_10 : f32 to vector<16x256xf32>
    %11 = arith.maximumf %9, %10 : vector<16x256xf32>
    %12 = arith.truncf %11 : vector<16x256xf32> to vector<16x256xbf16>
    %c0_11 = arith.constant 0 : index
    %c0_12 = arith.constant 0 : index
    %13 = vector.load %arg6[%c0_11, %c0_12] : memref<256x128xbf16, #tpu.memory_space<vmem>>, vector<256x128xbf16>
    %cst_13 = arith.constant dense<0.000000e+00> : vector<16x128xf32>
    %14 = tpu.matmul %12, %13, %cst_13 {dimension_numbers = #tpu.dot_dimension_numbers<[1], [0], [0], [1], [0, 0, 1, 1], [], []>} : vector<16x256xbf16>, vector<256x128xbf16>, vector<16x128xf32> -> vector<16x128xf32>
    %c0_14 = arith.constant 0 : index
    %c0_15 = arith.constant 0 : index
    %15 = vector.load %arg7[%c0_14, %c0_15] : memref<1x128xf32, #tpu.memory_space<vmem>>, vector<1x128xf32>
    %16 = vector.broadcast %15 : vector<1x128xf32> to vector<16x128xf32>
    %17 = arith.addf %14, %16 : vector<16x128xf32>
    %cst_16 = arith.constant 0.000000e+00 : f32
    %18 = vector.broadcast %cst_16 : f32 to vector<16x128xf32>
    %19 = arith.maximumf %17, %18 : vector<16x128xf32>
    %20 = arith.truncf %19 : vector<16x128xf32> to vector<16x128xbf16>
    %c0_17 = arith.constant 0 : index
    %c0_18 = arith.constant 0 : index
    %21 = vector.load %arg8[%c0_17, %c0_18] : memref<128x128xbf16, #tpu.memory_space<vmem>>, vector<128x128xbf16>
    %cst_19 = arith.constant dense<0.000000e+00> : vector<16x128xf32>
    %22 = tpu.matmul %20, %21, %cst_19 {dimension_numbers = #tpu.dot_dimension_numbers<[1], [0], [0], [1], [0, 0, 1, 1], [], []>} : vector<16x128xbf16>, vector<128x128xbf16>, vector<16x128xf32> -> vector<16x128xf32>
    %c0_20 = arith.constant 0 : index
    %c0_21 = arith.constant 0 : index
    %23 = vector.load %arg9[%c0_20, %c0_21] : memref<1x128xf32, #tpu.memory_space<vmem>>, vector<1x128xf32>
    %24 = vector.broadcast %23 : vector<1x128xf32> to vector<16x128xf32>
    %25 = arith.addf %22, %24 : vector<16x128xf32>
    %c0_22 = arith.constant 0 : index
    %c0_23 = arith.constant 0 : index
    %26 = vector.load %arg10[%c0_22, %c0_23] : memref<16x128xf32, #tpu.memory_space<vmem>>, vector<16x128xf32>
    tpu.vector_store %arg10[%c0_22, %c0_23], %25 {strides = array<i32>} : memref<16x128xf32, #tpu.memory_space<vmem>>, vector<16x128xf32>,
    return
  }
  func.func @transform_0(%arg0: i32) -> (i32, i32) {
    %c0_i32 = arith.constant 0 : i32
    %c0_i32_0 = arith.constant 0 : i32
    return %arg0, %c0_i32 : i32, i32
  }
  func.func @transform_1(%arg0: i32) -> (i32, i32) {
    %c0_i32 = arith.constant 0 : i32
    %c0_i32_0 = arith.constant 0 : i32
    return %arg0, %c0_i32 : i32, i32
  }
  func.func @transform_2(%arg0: i32) -> (i32, i32) {
    %c0_i32 = arith.constant 0 : i32
    %c0_i32_0 = arith.constant 0 : i32
    %c0_i32_1 = arith.constant 0 : i32
    return %c0_i32, %c0_i32_0 : i32, i32
  }
  func.func @transform_3(%arg0: i32) -> (i32, i32) {
    %c0_i32 = arith.constant 0 : i32
    %c0_i32_0 = arith.constant 0 : i32
    %c0_i32_1 = arith.constant 0 : i32
    return %c0_i32, %c0_i32_0 : i32, i32
  }
  func.func @transform_4(%arg0: i32) -> (i32, i32) {
    %c0_i32 = arith.constant 0 : i32
    %c0_i32_0 = arith.constant 0 : i32
    %c0_i32_1 = arith.constant 0 : i32
    return %c0_i32, %c0_i32_0 : i32, i32
  }
  func.func @transform_5(%arg0: i32) -> (i32, i32) {
    %c0_i32 = arith.constant 0 : i32
    %c0_i32_0 = arith.constant 0 : i32
    %c0_i32_1 = arith.constant 0 : i32
    return %c0_i32, %c0_i32_0 : i32, i32
  }
  func.func @transform_6(%arg0: i32) -> (i32, i32) {
    %c0_i32 = arith.constant 0 : i32
    %c0_i32_0 = arith.constant 0 : i32
    %c0_i32_1 = arith.constant 0 : i32
    return %c0_i32, %c0_i32_0 : i32, i32
  }
  func.func @transform_7(%arg0: i32) -> (i32, i32) {
    %c0_i32 = arith.constant 0 : i32
    %c0_i32_0 = arith.constant 0 : i32
    %c0_i32_1 = arith.constant 0 : i32
    return %c0_i32, %c0_i32_0 : i32, i32
  }
  func.func @transform_8(%arg0: i32) -> (i32, i32) {
    %c0_i32 = arith.constant 0 : i32
    %c0_i32_0 = arith.constant 0 : i32
    %c0_i32_1 = arith.constant 0 : i32
    return %c0_i32, %c0_i32_0 : i32, i32
  }
  func.func @transform_9(%arg0: i32) -> (i32, i32) {
    %c0_i32 = arith.constant 0 : i32
    %c0_i32_0 = arith.constant 0 : i32
    return %arg0, %c0_i32 : i32, i32
  }
}

</mosaic_0001>

<bundles_post_ra>
// kernel: tpu_custom_call.1
= control target key start
LH: loop header
LB: loop body
LE: loop exit
PB: predicated region body
PF: predicated region fallthrough
CT: control target
= control target key end

     0   :  { %14 = vsyncpa [#allocation3], 0  ;;  %s1151_s0 = inlined_call_operand.hbm [shape: bf16[16,80], index: 0, kind: input, shape index: {}]   ;;  %s1152_s1 = inlined_call_operand.hbm [shape: bf16[16,80], index: 1, kind: input, shape index: {}]   ;;  %s1153_s2 = inlined_call_operand.hbm [shape: bf16[80,256], index: 2, kind: input, shape index: {}]   ;;  %s1154_s3 = inlined_call_operand.hbm [shape: bf16[80,256], index: 3, kind: input, shape index: {}]   ;;  %s1155_s4 = inlined_call_operand.vmem [shape: f32[1,256], index: 4, kind: input, shape index: {}]   ;;  %s1156_s5 = inlined_call_operand.hbm [shape: bf16[256,128], index: 5, kind: input, shape index: {}]   ;;  %s1157_s6 = inlined_call_operand.vmem [shape: f32[1,128], index: 6, kind: input, shape index: {}]   ;;  %s1158_s7 = inlined_call_operand.hbm [shape: bf16[128,128], index: 7, kind: input, shape index: {}]   ;;  %s1159_s8 = inlined_call_operand.vmem [shape: f32[1,128], index: 8, kind: input, shape index: {}]   ;;  %s1160_s9 = inlined_call_operand.hbm [shape: f32[16,128], index: 9, kind: output, shape index: {}]  }
   0x1   :  { %15 = vsyncpa [#allocation6], 0 }
   0x2   :  { %16 = vsyncpa [#allocation9], 0 }
   0x3   :  { %17 = vsyncpa [#allocation12], 0 }
   0x4   :  { %18 = vsyncpa [#allocation4], 0  ;;  %s36_s11 = sshll.u32 %s1152_s1, 4  ;;  %s1035_s12 = smov [#allocation5]   ;;  %s37_s11 = int_to_ptr.hbm [resolvable:$true] %s36_s11 }
   0x5   :  { %s38_s13 = sshll.u32 %s1035_s12, 4  ;;  %s1036_s14 = smov 64   ;;  %s39_s13 = int_to_ptr.vmem [resolvable:$true] %s38_s13 }
   0x6   :  { %s1037_s15 = smov 4   ;;  %s62_s18 = sshll.u32 %s1154_s3, 4  ;;  %s63_s18 = int_to_ptr.hbm [resolvable:$true] %s62_s18 }
   0x7   :  { %44 = dma.hbm_to_vmem [thread:$0]  %s37_s11, 128, %s39_s13, [#allocation6], %s1036_s14, %s1036_s14, %s1037_s15  }
   0x8   :  { %s1038_s19 = smov [#allocation8]   ;;  %s23_s1 = sshll.u32 %s1151_s0, 4  ;;  %s24_s1 = int_to_ptr.hbm [resolvable:$true] %s23_s1 }
   0x9   :  { %s64_s20 = sshll.u32 %s1038_s19, 4  ;;  %s1039_s23 = smov 128   ;;  %s65_s20 = int_to_ptr.vmem [resolvable:$true] %s64_s20 }
   0xa   :  { %s1040_s24 = smov 8   ;;  %s49_s27 = sshll.u32 %s1153_s2, 4  ;;  %s50_s27 = int_to_ptr.hbm [resolvable:$true] %s49_s27 }
   0xb   :  { %70 = dma.hbm_to_vmem [thread:$0]  %s63_s18, 1280, %s65_s20, [#allocation9], %s1039_s23, %s1039_s23, %s1040_s24  }
   0xc   :  { %s1041_s3 = smov [#allocation2]   ;;  %s1042_s0 = smov [#allocation7]  }
   0xd   :  { %s25_s28 = sshll.u32 %s1041_s3, 4  ;;  %s51_s29 = sshll.u32 %s1042_s0, 4  ;;  %s26_s28 = int_to_ptr.vmem [resolvable:$true] %s25_s28  ;;  %s52_s29 = int_to_ptr.vmem [resolvable:$true] %s51_s29 }
   0xe   :  { %31 = dma.hbm_to_vmem [thread:$0]  %s24_s1, 128, %s26_s28, [#allocation3], %s1036_s14, %s1036_s14, %s1037_s15  }
   0xf   :  { %s77_s11 = sshll.u32 %s1156_s5, 4  ;;  %s92_s13 = sshll.u32 %s1158_s7, 4  ;;  %s78_s11 = int_to_ptr.hbm [resolvable:$true] %s77_s11  ;;  %s93_s13 = int_to_ptr.hbm [resolvable:$true] %s92_s13 }
  0x10   :  { %57 = dma.hbm_to_vmem [thread:$0]  %s50_s27, 1280, %s52_s29, [#allocation6], %s1039_s23, %s1039_s23, %s1040_s24  }
  0x11   :  { %s1043_s16 = smov [#allocation10]   ;;  %s1044_s18 = smov [#allocation11]  }
  0x12   :  { %s79_s17 = sshll.u32 %s1043_s16, 4  ;;  %s94_s5 = sshll.u32 %s1044_s18, 4  ;;  %s80_s17 = int_to_ptr.vmem [resolvable:$true] %s79_s17  ;;  %s95_s5 = int_to_ptr.vmem [resolvable:$true] %s94_s5 }
  0x13   :  { %85 = dma.hbm_to_vmem [thread:$0]  %s78_s11, 2048, %s80_s17, [#allocation9], %s1036_s14, %s1036_s14, %s1037_s15  }
  0x14   :  { %100 = dma.hbm_to_vmem [thread:$0]  %s93_s13, 1024, %s95_s5, [#allocation12], %s1036_s14, %s1036_s14, %s1037_s15  }
  0x15   :  { %1025 = dma.done.wait [#allocation3], 128  }
  0x16   :  { %1026 = vsyncadd [#allocation3], 4294967168 }
  0x17   :  { %1027 = dma.done.wait [#allocation6], 1408  }
  0x18   :  { %1028 = vsyncadd [#allocation6], 4294965888 }
  0x19   :  { %1029 = dma.done.wait [#allocation9], 3328  }
  0x1a   :  { %1030 = vsyncadd [#allocation9], 4294963968 }
  0x1b   :  { %1031 = dma.done.wait [#allocation12], 1024  }
  0x1c   :  { %1032 = vsyncadd [#allocation12], 4294966272  ;;  %v648_v0 = vld [vmem:[#allocation8 + $0x40] sm:$0xf]  ;;  %v819_v1 = vld [vmem:[#allocation8 + $0x44] sm:$0xf0] }
  0x1d   :  { %v694_v2 = vld [vmem:[#allocation7 + $0x40] sm:$0xf]  ;;  %v649_v3 = vor.u32 %v819_v1, %v648_v0  ;;  %v808_v4 = vld [vmem:[#allocation7 + $0x44] sm:$0xf0]  ;;  %v686_v8 = vld [vmem:[#allocation7 + $0x30] sm:$0xf] }
  0x1e   :  { %v640_v5 = vld [vmem:[#allocation8 + $0x30] sm:$0xf]  ;;  %v817_v6 = vld [vmem:[#allocation8 + $0x34] sm:$0xf0]  ;;  %v695_v7 = vor.u32 %v808_v4, %v694_v2  ;;  %v806_v9 = vld [vmem:[#allocation7 + $0x34] sm:$0xf0] }
  0x1f   :  { %214 = vmatpush.bf16.msra.mxu3 %v649_v3  ;;  %v641_v10 = vor.u32 %v817_v6, %v640_v5  ;;  %v687_v11 = vor.u32 %v806_v9, %v686_v8  ;;  %v632_v12 = vld [vmem:[#allocation8 + $0x20] sm:$0xf]  ;;  %v815_v13 = vld [vmem:[#allocation8 + $0x24] sm:$0xf0]  ;;  %v678_v14 = vld [vmem:[#allocation7 + $0x20] sm:$0xf] }
  0x20   :  { %300 = vmatpush.bf16.msra.mxu2 %v695_v7  ;;  %v804_v15 = vld [vmem:[#allocation7 + $0x24] sm:$0xf0]  ;;  %v818_v16 = vld [vmem:[#allocation8 + $0x44] sm:$0xf]  ;;  %v650_v17 = vld [vmem:[#allocation8 + $0x48] sm:$0xf0]  ;;  %v633_v19 = vor.u32 %v815_v13, %v632_v12 }
  0x21   :  { %v653_v18 = vor.u32 %v818_v16, %v650_v17  ;;  %v624_v20 = vld [vmem:[#allocation8 + $0x10] sm:$0xf]  ;;  %v679_v21 = vor.u32 %v804_v15, %v678_v14  ;;  %v813_v22 = vld [vmem:[#allocation8 + $0x14] sm:$0xf0]  ;;  %v816_v23 = vld [vmem:[#allocation8 + $0x34] sm:$0xf] }
  0x22   :  { %v642_v24 = vld [vmem:[#allocation8 + $0x38] sm:$0xf0]  ;;  %v670_v25 = vld [vmem:[#allocation7 + $0x10] sm:$0xf]  ;;  %v802_v26 = vld [vmem:[#allocation7 + $0x14] sm:$0xf0]  ;;  %v625_v30 = vor.u32 %v813_v22, %v624_v20 }
  0x23   :  { %215 = vmatpush.bf16.msra.mxu3 %v641_v10  ;;  %228 = vmatpush.bf16.msra.mxu1 %v653_v18  ;;  %v645_v27 = vor.u32 %v816_v23, %v642_v24  ;;  %v814_v28 = vld [vmem:[#allocation8 + $0x24] sm:$0xf]  ;;  %v634_v29 = vld [vmem:[#allocation8 + $0x28] sm:$0xf0]  ;;  %v671_v31 = vor.u32 %v802_v26, %v670_v25  ;;  %v616_v32 = vld [vmem:[#allocation8] sm:$0xf] }
  0x24   :  { %301 = vmatpush.bf16.msra.mxu2 %v687_v11  ;;  %v811_v33 = vld [vmem:[#allocation8 + $0x4] sm:$0xf0]  ;;  %v662_v34 = vld [vmem:[#allocation7] sm:$0xf]  ;;  %v637_v35 = vor.u32 %v814_v28, %v634_v29  ;;  %v800_v36 = vld [vmem:[#allocation7 + $0x4] sm:$0xf0] }
  0x25   :  { %v807_v37 = vld [vmem:[#allocation7 + $0x44] sm:$0xf]  ;;  %v696_v38 = vld [vmem:[#allocation7 + $0x48] sm:$0xf0]  ;;  %v827_v41 = vld [vmem:[#allocation10 + $0x38] sm:$0xff]  ;;  %v617_v42 = vor.u32 %v811_v33, %v616_v32  ;;  %v663_v43 = vor.u32 %v800_v36, %v662_v34  ;;  %vm207_vm0 = vcmask 654336  }
  0x26   :  { %v812_v39 = vld [vmem:[#allocation8 + $0x14] sm:$0xf]  ;;  %v626_v40 = vld [vmem:[#allocation8 + $0x18] sm:$0xf0]  ;;  %v699_v44 = vor.u32 %v807_v37, %v696_v38  ;;  %v805_v45 = vld [vmem:[#allocation7 + $0x34] sm:$0xf]  ;;  %473 = vmatpush.bf16.msra.mxu0 %v827_v41 }
  0x27   :  { %216 = vmatpush.bf16.msra.mxu3 %v633_v19  ;;  %229 = vmatpush.bf16.msra.mxu1 %v645_v27  ;;  %v688_v46 = vld [vmem:[#allocation7 + $0x38] sm:$0xf0]  ;;  %v629_v47 = vor.u32 %v812_v39, %v626_v40  ;;  %v826_v48 = vld [vmem:[#allocation10 + $0x30] sm:$0xff]  ;;  %v803_v54 = vld [vmem:[#allocation7 + $0x24] sm:$0xf]  ;;  %s1045_s21 = smov [#allocation13]  }
  0x28   :  { %302 = vmatpush.bf16.msra.mxu2 %v679_v21  ;;  %v809_v49 = vld [vmem:[#allocation5] sm:$0xff]  ;;  %v810_v50 = vld [vmem:[#allocation8 + $0x4] sm:$0xf]  ;;  %v691_v53 = vor.u32 %v805_v45, %v688_v46  ;;  %v680_v55 = vld [vmem:[#allocation7 + $0x28] sm:$0xf0]  ;;  %s592_s22 = sshll.u32 %s1045_s21, 4  ;;  %s593_s22 = int_to_ptr.vmem [resolvable:$true] %s592_s22 }
  0x29   :  { %v618_v51 = vld [vmem:[#allocation8 + $0x8] sm:$0xf0]  ;;  %v798_v52 = vld [vmem:[#allocation2] sm:$0xff]  ;;  %v825_v57 = vld [vmem:[#allocation10 + $0x28] sm:$0xff]  ;;  %v683_v58 = vor.u32 %v803_v54, %v680_v55  ;;  %s594_s25 = sshll.u32 %s1160_s9, 4  ;;  %s595_s25 = int_to_ptr.hbm [resolvable:$true] %s594_s25 }
  0x2a   :  { %v621_v56 = vor.u32 %v810_v50, %v618_v51  ;;  %474 = vmatpush.bf16.msra.mxu0 %v826_v48  ;;  %v801_v59 = vld [vmem:[#allocation7 + $0x14] sm:$0xf]  ;;  %v672_v60 = vld [vmem:[#allocation7 + $0x18] sm:$0xf0]  ;;  %v824_v61 = vld [vmem:[#allocation10 + $0x20] sm:$0xff] }
  0x2b   :  { %217 = vmatpush.bf16.msra.mxu3 %v625_v30  ;;  %230 = vmatpush.bf16.msra.mxu1 %v637_v35  ;;  %v675_v62 = vor.u32 %v801_v59, %v672_v60  ;;  %v799_v63 = vld [vmem:[#allocation7 + $0x4] sm:$0xf]  ;;  %v664_v0 = vld [vmem:[#allocation7 + $0x8] sm:$0xf0]  ;;  %v823_v2 = vld [vmem:[#allocation10 + $0x18] sm:$0xff] }
  0x2c   :  { %303 = vmatpush.bf16.msra.mxu2 %v671_v31  ;;  %v667_v1 = vor.u32 %v799_v63, %v664_v0  ;;  %v835_v3 = vld [vmem:[#allocation10 + $0x78] sm:$0xff]  ;;  %v822_v4 = vld [vmem:[#allocation10 + $0x10] sm:$0xff]  ;;  %v821_v6 = vld [vmem:[#allocation10 + $0x8] sm:$0xff] }
  0x2d   :  { %v834_v5 = vld [vmem:[#allocation10 + $0x70] sm:$0xff]  ;;  %v833_v7 = vld [vmem:[#allocation10 + $0x68] sm:$0xff]  ;;  %v820_v8 = vld [vmem:[#allocation10] sm:$0xff] }
  0x2e   :  { %475 = vmatpush.bf16.msra.mxu0 %v825_v57  ;;  %v832_v9 = vld [vmem:[#allocation10 + $0x60] sm:$0xff]  ;;  %v831_v10 = vld [vmem:[#allocation10 + $0x58] sm:$0xff]  ;;  %v830_v11 = vld [vmem:[#allocation10 + $0x50] sm:$0xff] }
  0x2f   :  { %218 = vmatpush.bf16.msra.mxu3 %v617_v42  ;;  %231 = vmatpush.bf16.msra.mxu1 %v629_v47  ;;  %v829_v12 = vld [vmem:[#allocation10 + $0x48] sm:$0xff]  ;;  %v828_v13 = vld [vmem:[#allocation10 + $0x40] sm:$0xff]  ;;  %v325_v16 = vld [vmem:[%s1155_s4] sm:$0x3] }
  0x30   :  { %304 = vmatpush.bf16.msra.mxu2 %v663_v43  ;;  %v327_v18 = vperm.slane %v325_v16, 0  ;;  %v328_v30 = vperm.slane %v325_v16, 1  ;;  %v843_v39 = vld [vmem:[#allocation11 + $0x38] sm:$0xff]  ;;  %v842_v40 = vld [vmem:[#allocation11 + $0x30] sm:$0xff]  ;;  %v841_v41 = vld [vmem:[#allocation11 + $0x28] sm:$0xff] }
  0x31   :  { %v840_v42 = vld [vmem:[#allocation11 + $0x20] sm:$0xff]  ;;  %v839_v43 = vld [vmem:[#allocation11 + $0x18] sm:$0xff]  ;;  %v837_v45 = vld [vmem:[#allocation11 + $0x8] sm:$0xff] }
  0x32   :  { %654 = vmatmul.msk.bf16.vlgmr.msra.gmra.mxu3 %vm207_vm0, %v809_v49  ;;  %476 = vmatpush.bf16.msra.mxu0 %v824_v61  ;;  %v836_v46 = vld [vmem:[#allocation11] sm:$0xff]  ;;  %v856_v59 = vld [vmem:[%s1159_s8] ss:$0 sm:$0xff] }
  0x33   :  { %314 = vmatpush.bf16.msrb.mxu3 %v699_v44  ;;  %700 = vmatmul.msk.bf16.vlgmr.msra.gmra.mxu2 %vm207_vm0, %v798_v52  ;;  %v838_v44 = vld [vmem:[#allocation11 + $0x10] sm:$0xff] }
  0x34   :  { %232 = vmatpush.bf16.msra.mxu1 %v621_v56  ;;  %572 = vmatpush.bf16.msrb.mxu2 %v843_v39 }
  0x36   :  { %477 = vmatpush.bf16.msra.mxu0 %v823_v2 }
  0x37   :  { %315 = vmatpush.bf16.msrb.mxu3 %v691_v53  ;;  %655 = vmatmul.msk.bf16.vlgmr.msra.gmra.mxu1 %vm207_vm0, %v809_v49  ;;  %v855_v49 = vld [vmem:[%s1157_s6] ss:$0 sm:$0xff] }
  0x38   :  { %487 = vmatpush.bf16.msrb.mxu1 %v835_v3  ;;  %573 = vmatpush.bf16.msrb.mxu2 %v842_v40 }
  0x3a   :  { %478 = vmatpush.bf16.msra.mxu0 %v822_v4 }
  0x3b   :  { %316 = vmatpush.bf16.msrb.mxu3 %v683_v58 }
  0x3c   :  { %488 = vmatpush.bf16.msrb.mxu1 %v834_v5  ;;  %574 = vmatpush.bf16.msrb.mxu2 %v841_v41 }
  0x3e   :  { %479 = vmatpush.bf16.msra.mxu0 %v821_v6 }
  0x3f   :  { %317 = vmatpush.bf16.msrb.mxu3 %v675_v62 }
  0x40   :  { %489 = vmatpush.bf16.msrb.mxu1 %v833_v7  ;;  %575 = vmatpush.bf16.msrb.mxu2 %v840_v42 }
  0x42   :  { %480 = vmatpush.bf16.msra.mxu0 %v820_v8 }
  0x43   :  { %318 = vmatpush.bf16.msrb.mxu3 %v667_v1 }
  0x44   :  { %490 = vmatpush.bf16.msrb.mxu1 %v832_v9  ;;  %576 = vmatpush.bf16.msrb.mxu2 %v839_v43 }
  0x46   :  { %701 = vmatmul.msk.bf16.vlgmr.msrb.gmra.mxu3 %vm207_vm0, %v798_v52 }
  0x48   :  { %491 = vmatpush.bf16.msrb.mxu1 %v831_v10  ;;  %577 = vmatpush.bf16.msrb.mxu2 %v838_v44 }
  0x4c   :  { %492 = vmatpush.bf16.msrb.mxu1 %v830_v11  ;;  %578 = vmatpush.bf16.msrb.mxu2 %v837_v45 }
  0x50   :  { %493 = vmatpush.bf16.msrb.mxu1 %v829_v12  ;;  %579 = vmatpush.bf16.msrb.mxu2 %v836_v46 }
  0x54   :  { %494 = vmatpush.bf16.msrb.mxu1 %v828_v13 }
  0xb4   :  { %v234_v26 = vpop.f32.mrf.mxu1 }
  0xb5   :  { %v220_v14 = vpop.f32.mrf.mxu3 }
  0xb6   :  { %v306_v15 = vpop.f32.mrf.mxu2 }
  0xb7   :  { %v307_v17 = vadd.f32 %v306_v15, %v220_v14 }
  0xb9   :  { %v331_v21 = vadd.f32 %v327_v18, %v307_v17 }
  0xbb   :  { %v335_v24 = vmax.f32 %v331_v21, 0.0 }
  0xbc   :  { %v236_v31 = vpop.f32.mrf.mxu1 }
  0xbd   :  { %v222_v19 = vpop.f32.mrf.mxu3 }
  0xbe   :  { %v308_v20 = vpop.f32.mrf.mxu2 }
  0xbf   :  { %v309_v22 = vadd.f32 %v308_v20, %v222_v19 }
  0xc1   :  { %v333_v23 = vadd.f32 %v327_v18, %v309_v22 }
  0xc3   :  { %v337_v25 = vmax.f32 %v333_v23, 0.0 }
  0xc5   :  { %v339_v27 = vpack.c.bf16 %v337_v25, %v335_v24 }
  0xc7   :  { %481 = vmatmul.bf16.vlgmr.msra.gmra.mxu0 %v339_v27 }
  0xc9   :  { %v320_v28 = vpop.f32.mrf.mxu3 }
  0xca   :  { %v321_v29 = vadd.f32 %v320_v28, %v234_v26 }
  0xcc   :  { %v332_v33 = vadd.f32 %v328_v30, %v321_v29 }
  0xce   :  { %v336_v36 = vmax.f32 %v332_v33, 0.0 }
  0xd1   :  { %v322_v32 = vpop.f32.mrf.mxu3 }
  0xd2   :  { %v323_v34 = vadd.f32 %v322_v32, %v236_v31 }
  0xd4   :  { %v334_v35 = vadd.f32 %v328_v30, %v323_v34 }
  0xd6   :  { %v338_v37 = vmax.f32 %v334_v35, 0.0 }
  0xd8   :  { %v340_v38 = vpack.c.bf16 %v338_v37, %v336_v36 }
  0xda   :  { %495 = vmatmul.bf16.vlgmr.msrb.gmra.mxu1 %v340_v38 }
 0x144   :  { %v482_v47 = vpop.f32.mrf.mxu0 }
 0x145   :  { %v483_v51 = vadd.f32 %v855_v49, %v482_v47 }
 0x14c   :  { %v484_v50 = vpop.f32.mrf.mxu0 }
 0x14d   :  { %v485_v52 = vadd.f32 %v855_v49, %v484_v50 }
 0x157   :  { %v496_v48 = vpop.f32.mrf.mxu1 }
 0x158   :  { %v497_v53 = vadd.f32 %v496_v48, %v483_v51 }
 0x15a   :  { %v501_v56 = vmax.f32 %v497_v53, 0.0 }
 0x15f   :  { %v498_v54 = vpop.f32.mrf.mxu1 }
 0x160   :  { %v499_v55 = vadd.f32 %v498_v54, %v485_v52 }
 0x162   :  { %v502_v57 = vmax.f32 %v499_v55, 0.0 }
 0x164   :  { %v503_v58 = vpack.c.bf16 %v502_v57, %v501_v56 }
 0x166   :  { %580 = vmatmul.bf16.vlgmr.msrb.gmra.mxu2 %v503_v58 }
 0x1e9   :  { %v581_v60 = vpop.f32.mrf.mxu2 }
 0x1ea   :  { %v582_v61 = vadd.f32 %v856_v59, %v581_v60 }
 0x1ec   :  { %586 = vst [vmem:[#allocation13] sm:$0xff] %v582_v61 }
 0x1f1   :  { %v583_v62 = vpop.f32.mrf.mxu2 }
 0x1f2   :  { %v584_v63 = vadd.f32 %v856_v59, %v583_v62 }
 0x1f4   :  { %587 = vst [vmem:[#allocation13 + $0x8] sm:$0xff] %v584_v63 }
 0x1f5   :  { %600 = dma.vmem_to_hbm [thread:$0]  %s593_s22, 256, %s595_s25, [#allocation4], %s1039_s23, %s1039_s23, %s1040_s24  }
 0x1f6   :  { %1033 = dma.done.wait [#allocation4], 256  }
 0x1f7   :  { %1034 = vsyncadd [#allocation4], 4294967040 }
 0x1f8   :  { %605 = vsyncpa [#allocation3], 1 }
 0x1f9   :  { %606 = vsyncpa [#allocation6], 1 }
 0x1fa   :  { %607 = vsyncpa [#allocation9], 1 }
 0x1fb   :  { %608 = vsyncpa [#allocation12], 1 }
 0x1fc   :  { %609 = vsyncpa [#allocation4], 1 }

</bundles_post_ra>
